<compile_context>
chip_gen: v7x
topology: tpu7x:2x2x1
jax: 0.10.0
libtpu: 0.0.40
codegen_flags: <defaults>
</compile_context>

<pallas_src>
from functools import partial

import jax
import jax.numpy as jnp
from jax.experimental import pallas as pl
from jax.experimental.pallas import tpu as pltpu

BN_EPS = 1e-5
LANE = 128
SUBLANE = 8


def _round_up(n, m):
    return ((n + m - 1) // m) * m


def _pad_to(a, shape):
    return jnp.pad(a, [(0, s - d) for d, s in zip(a.shape, shape)])


def make_actor_kernel(n_valid):
    """n_valid = number of real (un-padded) batch rows; static at trace time."""
    inv_n = 1.0 / float(n_valid)

    def actor_kernel(x_ref, w1_ref, bn_ref, w2_ref, b2_ref, w3_ref, b3_ref, o_ref):
        # fc1: [Bp, S](bf16) @ [S, H1p](bf16) -> f32 accumulate on the MXU.
        h1 = jnp.dot(x_ref[...], w1_ref[...],
                     preferred_element_type=jnp.float32) + bn_ref[0:1, :]

        # BatchNorm1d, training-mode statistics over the *real* rows only.
        valid = jax.lax.broadcasted_iota(jnp.int32, h1.shape, 0) < n_valid
        h1_m = jnp.where(valid, h1, 0.0)
        mean = jnp.sum(h1_m, axis=0, keepdims=True) * inv_n
        xc = h1 - mean
        xc_m = jnp.where(valid, xc, 0.0)
        var = jnp.sum(xc_m * xc_m, axis=0, keepdims=True) * inv_n
        scale = bn_ref[1:2, :] * jax.lax.rsqrt(var + BN_EPS)   # gamma folded once
        h1 = jnp.maximum(xc * scale + bn_ref[2:3, :], 0.0)     # BN + ReLU

        # fc2 + ReLU.
        h2 = jnp.dot(h1.astype(jnp.bfloat16), w2_ref[...],
                     preferred_element_type=jnp.float32) + b2_ref[...]
        h2 = jnp.maximum(h2, 0.0)

        # fc3 + tanh (lane-dense padded output; padded cols are exactly 0).
        out = jnp.dot(h2.astype(jnp.bfloat16), w3_ref[...],
                      preferred_element_type=jnp.float32) + b3_ref[...]
        o_ref[...] = jnp.tanh(out).astype(o_ref.dtype)

    return actor_kernel


@partial(jax.jit, static_argnames=("action_size",))
def actor_forward(x, params, action_size):
    """x: [B, state_size] f32.  params: padded/packed dict (see pack_params)."""
    B = x.shape[0]
    Bp = _round_up(max(B, SUBLANE), SUBLANE)
    Ap = params["w3"].shape[1]

    xb = _pad_to(x, (Bp, x.shape[1])).astype(jnp.bfloat16)

    vmem = pl.BlockSpec(memory_space=pltpu.MemorySpace.VMEM)
    out = pl.pallas_call(
        make_actor_kernel(B),
        out_shape=jax.ShapeDtypeStruct((Bp, Ap), jnp.float32),
        in_specs=[vmem] * 7,
        out_specs=vmem,
    )(xb, params["w1"], params["bn"], params["w2"], params["b2"],
      params["w3"], params["b3"])
    return out[:B, :action_size]


def init_params(key, state_size, action_size, first_fc=400, second_fc=300):
    """Raw (unpadded, f32) parameters matching Actor.reset_parameters.

    hidden_init() in the reference uses weight.size()[0] == out_features, so
    lim = 1/sqrt(out_features) for fc1/fc2 weights (bug replicated).  Biases
    keep the default nn.Linear range +-1/sqrt(in_features).
    """
    ks = jax.random.split(key, 6)

    def uni(k, shape, lim):
        return jax.random.uniform(k, shape, jnp.float32, minval=-lim, maxval=lim)

    lim1 = 1.0 / first_fc ** 0.5
    lim2 = 1.0 / second_fc ** 0.5
    lim3 = 0.003
    blim1 = 1.0 / state_size ** 0.5
    blim2 = 1.0 / first_fc ** 0.5
    blim3 = 1.0 / second_fc ** 0.5

    return {
        # weights stored transposed: [in_features, out_features]
        "w1": uni(ks[0], (state_size, first_fc), lim1),
        "b1": uni(ks[1], (1, first_fc), blim1),
        "gamma": jnp.ones((1, first_fc), jnp.float32),
        "beta": jnp.zeros((1, first_fc), jnp.float32),
        "w2": uni(ks[2], (first_fc, second_fc), lim2),
        "b2": uni(ks[3], (1, second_fc), blim2),
        "w3": uni(ks[4], (second_fc, action_size), lim3),
        "b3": uni(ks[5], (1, action_size), blim3),
    }


def pack_params(raw):
    """Pad feature dims to lane (128) multiples, cast matmul weights to bf16,
    and pack the per-feature BN vectors into a single (3, H1p) f32 array."""
    S, H1 = raw["w1"].shape
    H2 = raw["w2"].shape[1]
    A = raw["w3"].shape[1]
    H1p, H2p, Ap = (_round_up(d, LANE) for d in (H1, H2, A))

    gamma = jnp.concatenate(
        [raw["gamma"], jnp.ones((1, H1p - H1), jnp.float32)], axis=1)
    bn = jnp.concatenate(
        [_pad_to(raw["b1"], (1, H1p)), gamma, _pad_to(raw["beta"], (1, H1p))],
        axis=0)  # rows: bias, gamma, beta

    return {
        "w1": _pad_to(raw["w1"], (S, H1p)).astype(jnp.bfloat16),
        "bn": bn,
        "w2": _pad_to(raw["w2"], (H1p, H2p)).astype(jnp.bfloat16),
        "b2": _pad_to(raw["b2"], (1, H2p)),
        "w3": _pad_to(raw["w3"], (H2p, Ap)).astype(jnp.bfloat16),
        "b3": _pad_to(raw["b3"], (1, Ap)),
    }


def actor_ref(x, raw):
    """Pure-JAX reference mirroring the kernel math (bf16 matmul operands,
    f32 accumulation / BatchNorm / tanh)."""
    bf = lambda a: a.astype(jnp.bfloat16)
    h1 = jnp.dot(bf(x), bf(raw["w1"]),
                 preferred_element_type=jnp.float32) + raw["b1"]
    mean = jnp.mean(h1, axis=0, keepdims=True)
    xc = h1 - mean
    var = jnp.mean(xc * xc, axis=0, keepdims=True)
    h1 = jnp.maximum(
        xc * (raw["gamma"] * jax.lax.rsqrt(var + BN_EPS)) + raw["beta"], 0.0)
    h2 = jnp.maximum(
        jnp.dot(bf(h1), bf(raw["w2"]),
                preferred_element_type=jnp.float32) + raw["b2"], 0.0)
    return jnp.tanh(
        jnp.dot(bf(h2), bf(raw["w3"]),
                preferred_element_type=jnp.float32) + raw["b3"])


if __name__ == "__main__":
    STATE, ACTION = 16, 4
    FIRST_FC, SECOND_FC = 400, 300

    key = jax.random.PRNGKey(0)
    kx, kp = jax.random.split(key)
    raw = init_params(kp, STATE, ACTION, FIRST_FC, SECOND_FC)
    packed = pack_params(raw)

    # B=8: exact sublane multiple.  B=6: exercises batch padding + masked BN.
    for i, B in enumerate((8, 6)):
        x = jax.random.normal(jax.random.fold_in(kx, i), (B, STATE), jnp.float32)
        out = jax.block_until_ready(actor_forward(x, packed, ACTION))
        ref = actor_ref(x, raw)
        assert out.shape == (B, ACTION)
        assert jnp.allclose(out, ref, atol=2e-3, rtol=2e-3), f"mismatch at B={B}"

    print("KERNEL_OK")
</pallas_src>

<mosaic_0001>
module attributes {stable_mosaic.version = 11 : i64} {
  func.func @actor_kernel(%arg0: memref<8x16xbf16, #tpu.memory_space<vmem>>, %arg1: memref<16x512xbf16, #tpu.memory_space<vmem>>, %arg2: memref<3x512xf32, #tpu.memory_space<vmem>>, %arg3: memref<512x384xbf16, #tpu.memory_space<vmem>>, %arg4: memref<1x384xf32, #tpu.memory_space<vmem>>, %arg5: memref<384x128xbf16, #tpu.memory_space<vmem>>, %arg6: memref<1x128xf32, #tpu.memory_space<vmem>>, %arg7: memref<8x128xf32, #tpu.memory_space<vmem>>) attributes {dimension_semantics = [], scalar_prefetch = 0 : i64, scratch_operands = 0 : i64, tpu.core_type = #tpu.core_type<tc>} {
    %c0 = arith.constant 0 : index
    %c0_0 = arith.constant 0 : index
    %0 = vector.load %arg0[%c0, %c0_0] : memref<8x16xbf16, #tpu.memory_space<vmem>>, vector<8x16xbf16>
    %c0_1 = arith.constant 0 : index
    %c0_2 = arith.constant 0 : index
    %1 = vector.load %arg1[%c0_1, %c0_2] : memref<16x512xbf16, #tpu.memory_space<vmem>>, vector<16x512xbf16>
    %cst = arith.constant dense<0.000000e+00> : vector<8x512xf32>
    %2 = tpu.matmul %0, %1, %cst {dimension_numbers = #tpu.dot_dimension_numbers<[1], [0], [0], [1], [0, 0, 1, 1], [], []>} : vector<8x16xbf16>, vector<16x512xbf16>, vector<8x512xf32> -> vector<8x512xf32>
    %c0_3 = arith.constant 0 : index
    %c0_4 = arith.constant 0 : index
    %3 = vector.load %arg2[%c0_3, %c0_4] : memref<3x512xf32, #tpu.memory_space<vmem>>, vector<1x512xf32>
    %4 = vector.broadcast %3 : vector<1x512xf32> to vector<8x512xf32>
    %5 = arith.addf %2, %4 : vector<8x512xf32>
    %6 = tpu.iota {dimensions = array<i32: 0>} : vector<8x512xi32>
    %c8_i32 = arith.constant 8 : i32
    %7 = vector.broadcast %c8_i32 : i32 to vector<8x512xi32>
    %8 = arith.cmpi slt, %6, %7 : vector<8x512xi32>
    %cst_5 = arith.constant 0.000000e+00 : f32
    %9 = vector.broadcast %cst_5 : f32 to vector<8x512xf32>
    %10 = arith.select %8, %5, %9 : vector<8x512xi1>, vector<8x512xf32>
    %cst_6 = arith.constant dense<0.000000e+00> : vector<512xf32>
    %11 = vector.multi_reduction <add>, %10, %cst_6 [0] : vector<8x512xf32> to vector<512xf32>
    %12 = vector.shape_cast %11 : vector<512xf32> to vector<1x512xf32>
    %cst_7 = arith.constant 1.250000e-01 : f32
    %13 = vector.broadcast %cst_7 : f32 to vector<1x512xf32>
    %14 = arith.mulf %12, %13 : vector<1x512xf32>
    %15 = vector.broadcast %14 : vector<1x512xf32> to vector<8x512xf32>
    %16 = arith.subf %5, %15 : vector<8x512xf32>
    %cst_8 = arith.constant 0.000000e+00 : f32
    %17 = vector.broadcast %cst_8 : f32 to vector<8x512xf32>
    %18 = arith.select %8, %16, %17 : vector<8x512xi1>, vector<8x512xf32>
    %19 = arith.mulf %18, %18 : vector<8x512xf32>
    %cst_9 = arith.constant dense<0.000000e+00> : vector<512xf32>
    %20 = vector.multi_reduction <add>, %19, %cst_9 [0] : vector<8x512xf32> to vector<512xf32>
    %21 = vector.shape_cast %20 : vector<512xf32> to vector<1x512xf32>
    %cst_10 = arith.constant 1.250000e-01 : f32
    %22 = vector.broadcast %cst_10 : f32 to vector<1x512xf32>
    %23 = arith.mulf %21, %22 : vector<1x512xf32>
    %c1 = arith.constant 1 : index
    %c0_11 = arith.constant 0 : index
    %24 = vector.load %arg2[%c1, %c0_11] : memref<3x512xf32, #tpu.memory_space<vmem>>, vector<1x512xf32>
    %cst_12 = arith.constant 9.99999974E-6 : f32
    %25 = vector.broadcast %cst_12 : f32 to vector<1x512xf32>
    %26 = arith.addf %23, %25 : vector<1x512xf32>
    %27 = math.rsqrt %26 : vector<1x512xf32>
    %28 = arith.mulf %24, %27 : vector<1x512xf32>
    %29 = vector.broadcast %28 : vector<1x512xf32> to vector<8x512xf32>
    %30 = arith.mulf %16, %29 : vector<8x512xf32>
    %c2 = arith.constant 2 : index
    %c0_13 = arith.constant 0 : index
    %31 = vector.load %arg2[%c2, %c0_13] : memref<3x512xf32, #tpu.memory_space<vmem>>, vector<1x512xf32>
    %32 = vector.broadcast %31 : vector<1x512xf32> to vector<8x512xf32>
    %33 = arith.addf %30, %32 : vector<8x512xf32>
    %cst_14 = arith.constant 0.000000e+00 : f32
    %34 = vector.broadcast %cst_14 : f32 to vector<8x512xf32>
    %35 = arith.maximumf %33, %34 : vector<8x512xf32>
    %36 = arith.truncf %35 : vector<8x512xf32> to vector<8x512xbf16>
    %c0_15 = arith.constant 0 : index
    %c0_16 = arith.constant 0 : index
    %37 = vector.load %arg3[%c0_15, %c0_16] : memref<512x384xbf16, #tpu.memory_space<vmem>>, vector<512x384xbf16>
    %cst_17 = arith.constant dense<0.000000e+00> : vector<8x384xf32>
    %38 = tpu.matmul %36, %37, %cst_17 {dimension_numbers = #tpu.dot_dimension_numbers<[1], [0], [0], [1], [0, 0, 1, 1], [], []>} : vector<8x512xbf16>, vector<512x384xbf16>, vector<8x384xf32> -> vector<8x384xf32>
    %c0_18 = arith.constant 0 : index
    %c0_19 = arith.constant 0 : index
    %39 = vector.load %arg4[%c0_18, %c0_19] : memref<1x384xf32, #tpu.memory_space<vmem>>, vector<1x384xf32>
    %40 = vector.broadcast %39 : vector<1x384xf32> to vector<8x384xf32>
    %41 = arith.addf %38, %40 : vector<8x384xf32>
    %cst_20 = arith.constant 0.000000e+00 : f32
    %42 = vector.broadcast %cst_20 : f32 to vector<8x384xf32>
    %43 = arith.maximumf %41, %42 : vector<8x384xf32>
    %44 = arith.truncf %43 : vector<8x384xf32> to vector<8x384xbf16>
    %c0_21 = arith.constant 0 : index
    %c0_22 = arith.constant 0 : index
    %45 = vector.load %arg5[%c0_21, %c0_22] : memref<384x128xbf16, #tpu.memory_space<vmem>>, vector<384x128xbf16>
    %cst_23 = arith.constant dense<0.000000e+00> : vector<8x128xf32>
    %46 = tpu.matmul %44, %45, %cst_23 {dimension_numbers = #tpu.dot_dimension_numbers<[1], [0], [0], [1], [0, 0, 1, 1], [], []>} : vector<8x384xbf16>, vector<384x128xbf16>, vector<8x128xf32> -> vector<8x128xf32>
    %c0_24 = arith.constant 0 : index
    %c0_25 = arith.constant 0 : index
    %47 = vector.load %arg6[%c0_24, %c0_25] : memref<1x128xf32, #tpu.memory_space<vmem>>, vector<1x128xf32>
    %48 = vector.broadcast %47 : vector<1x128xf32> to vector<8x128xf32>
    %49 = arith.addf %46, %48 : vector<8x128xf32>
    %50 = math.tanh %49 : vector<8x128xf32>
    %c0_26 = arith.constant 0 : index
    %c0_27 = arith.constant 0 : index
    %51 = vector.load %arg7[%c0_26, %c0_27] : memref<8x128xf32, #tpu.memory_space<vmem>>, vector<8x128xf32>
    tpu.vector_store %arg7[%c0_26, %c0_27], %50 {strides = array<i32>} : memref<8x128xf32, #tpu.memory_space<vmem>>, vector<8x128xf32>,
    return
  }
}

</mosaic_0001>

<bundles_post_ra>
// kernel: actor_forward.1
= control target key start
LH: loop header
LB: loop body
LE: loop exit
PB: predicated region body
PF: predicated region fallthrough
CT: control target
= control target key end

     0   :  { %12 = vsyncpa [#allocation3], 0  ;;  %s2138_s0 = inlined_call_operand.vmem [shape: bf16[8,16], index: 0, kind: input, shape index: {}]   ;;  %s2139_s1 = inlined_call_operand.hbm [shape: bf16[16,512], index: 1, kind: input, shape index: {}]   ;;  %s2140_s2 = inlined_call_operand.vmem [shape: f32[3,512], index: 2, kind: input, shape index: {}]   ;;  %s2141_s3 = inlined_call_operand.hbm [shape: bf16[512,384], index: 3, kind: input, shape index: {}]   ;;  %s2142_s4 = inlined_call_operand.vmem [shape: f32[1,384], index: 4, kind: input, shape index: {}]   ;;  %s2143_s5 = inlined_call_operand.hbm [shape: bf16[384,128], index: 5, kind: input, shape index: {}]   ;;  %s2144_s6 = inlined_call_operand.vmem [shape: f32[1,128], index: 6, kind: input, shape index: {}]   ;;  %s2145_s7 = inlined_call_operand.vmem [shape: f32[8,128], index: 7, kind: output, shape index: {}]  }
   0x1   :  { %13 = vsyncpa [#allocation5], 0  ;;  %s1969_s24 = smov [#allocation4]   ;;  %s1899_s28 = scalar_lea.hbm %s2141_s3, 12288 }
   0x2   :  { %s35_s25 = sshll.u32 %s1969_s24, 4  ;;  %p1900_p0 = scmp.ne.s32.totalorder %s2141_s3, %s1899_s28  ;;  %s36_s25 = int_to_ptr.vmem [resolvable:$true] %s35_s25 }
   0x3   :  { %p1903_p1 = scmp.lt.u32.totalorder %s1899_s28, %s2141_s3 }
   0x5   :  { %p1905_p2 = pnand %p1903_p1, %p1900_p0 }
   0x7   :  { %1908 = shalt.err (!%p1905_p2)
}
   0x8   :  { %s1909_s10 = scalar_lea.vmem %s36_s25, 12288  ;;  %p1914_p4 = scmp.lt.s32.totalorder %s36_s25, %s36_s25 }
   0x9   :  { %p1910_p3 = scmp.ne.s32.totalorder %s36_s25, %s1909_s10  ;;  %p1915_p5 = scmp.lt.s32.totalorder %s1909_s10, %s1909_s10 }
   0xb   :  { %p1916_p6 = por %p1915_p5, %p1914_p4 }
   0xd   :  { %p1917_p7 = pnand %p1916_p6, %p1910_p3 }
   0xf   :  { %1920 = shalt.err (!%p1917_p7)
}
  0x10   :  { %s1970_s11 = smov 192   ;;  %s1971_s12 = smov 12  }
  0x11   :  { %41 = dma.hbm_to_vmem [thread:$0]  %s2141_s3, 12288, %s36_s25, [#allocation5], %s1970_s11, %s1970_s11, %s1971_s12  }
  0x12   :  { %s1972_s15 = smov [#allocation2]   ;;  %s1921_s19 = scalar_lea.hbm %s2139_s1, 512 }
  0x13   :  { %s21_s16 = sshll.u32 %s1972_s15, 4  ;;  %p1922_p8 = scmp.ne.s32.totalorder %s2139_s1, %s1921_s19  ;;  %s22_s16 = int_to_ptr.vmem [resolvable:$true] %s21_s16 }
  0x14   :  { %p1925_p9 = scmp.lt.u32.totalorder %s1921_s19, %s2139_s1 }
  0x16   :  { %p1927_p10 = pnand %p1925_p9, %p1922_p8 }
  0x18   :  { %1930 = shalt.err (!%p1927_p10)
}
  0x19   :  { %s1931_s24 = scalar_lea.vmem %s22_s16, 512  ;;  %p1936_p12 = scmp.lt.s32.totalorder %s22_s16, %s22_s16 }
  0x1a   :  { %p1932_p11 = scmp.ne.s32.totalorder %s22_s16, %s1931_s24  ;;  %p1937_p13 = scmp.lt.s32.totalorder %s1931_s24, %s1931_s24 }
  0x1c   :  { %p1938_p0 = por %p1937_p13, %p1936_p12 }
  0x1e   :  { %p1939_p1 = pnand %p1938_p0, %p1932_p11 }
  0x20   :  { %1942 = shalt.err (!%p1939_p1)
}
  0x21   :  { %s1973_s3 = smov 256   ;;  %s1974_s25 = smov 16  }
  0x22   :  { %27 = dma.hbm_to_vmem [thread:$0]  %s2139_s1, 512, %s22_s16, [#allocation3], %s1973_s3, %s1973_s3, %s1974_s25  }
  0x23   :  { %s1975_s28 = smov [#allocation6]   ;;  %s1943_s9 = scalar_lea.hbm %s2143_s5, 3072 }
  0x24   :  { %s49_s29 = sshll.u32 %s1975_s28, 4  ;;  %p1944_p2 = scmp.ne.s32.totalorder %s2143_s5, %s1943_s9  ;;  %s50_s29 = int_to_ptr.vmem [resolvable:$true] %s49_s29 }
  0x25   :  { %p1947_p3 = scmp.lt.u32.totalorder %s1943_s9, %s2143_s5 }
  0x27   :  { %p1949_p4 = pnand %p1947_p3, %p1944_p2 }
  0x29   :  { %1952 = shalt.err (!%p1949_p4)
}
  0x2a   :  { %s1953_s14 = scalar_lea.vmem %s50_s29, 3072  ;;  %p1958_p6 = scmp.lt.s32.totalorder %s50_s29, %s50_s29 }
  0x2b   :  { %p1954_p5 = scmp.ne.s32.totalorder %s50_s29, %s1953_s14  ;;  %p1959_p7 = scmp.lt.s32.totalorder %s1953_s14, %s1953_s14 }
  0x2d   :  { %p1960_p8 = por %p1959_p7, %p1958_p6 }
  0x2f   :  { %p1961_p9 = pnand %p1960_p8, %p1954_p5 }
  0x31   :  { %1964 = shalt.err (!%p1961_p9)
}
  0x32   :  { %s1976_s1 = smov 64   ;;  %s1977_s15 = smov 4  }
  0x33   :  { %55 = dma.hbm_to_vmem [thread:$0]  %s2143_s5, 3072, %s50_s29, [#allocation5], %s1976_s1, %s1976_s1, %s1977_s15  }
  0x34   :  { %1965 = dma.done.wait [#allocation3], 512  }
  0x35   :  { %1966 = vsyncadd [#allocation3], 4294966784 }
  0x36   :  { %1967 = dma.done.wait [#allocation5], 15360  }
  0x37   :  { %1968 = vsyncadd [#allocation5], 4294951936  ;;  %v1978_v0 = vmov 0   ;;  %v1731_v1 = vld [vmem:[#allocation2 + $0x4] ss:$16 sps:$4 sm:$0xff]   ;;  %vm115_vm0 = vcmask 130048   ;;  %v75_v56 = vlaneseq }
  0x38   :  { %151 = vmatprep.mubr.bf16.mxu0 %v1978_v0  ;;  %192 = vmatprep.mubr.bf16.mxu1 %v1978_v0  ;;  %v1733_v2 = vld [vmem:[#allocation2 + $0xc] ss:$16 sps:$4 sm:$0xff]   ;;  %v1735_v3 = vld [vmem:[#allocation2] ss:$16 sps:$4 sm:$0xff]   ;;  %v1736_v4 = vld [vmem:[#allocation2 + $0x8] ss:$16 sps:$4 sm:$0xff]  }
  0x39   :  { %119 = vmatprep.subr.bf16.mxu0 %v1731_v1  ;;  %160 = vmatprep.subr.bf16.mxu1 %v1733_v2  ;;  %v68_v5 = vld [vmem:[%s2138_s0] sm:$0xf]  ;;  %v1737_v7 = vld [vmem:[#allocation4] ss:$12 sps:$4 sm:$0xff]   ;;  %v1742_v8 = vld [vmem:[#allocation4 + $0x1c] ss:$12 sps:$4 sm:$0xff]  }
  0x3a   :  { %120 = vmatpush1.bf16.msra.mxu0 %v1735_v3  ;;  %161 = vmatpush1.bf16.msra.mxu1 %v1736_v4  ;;  %v1739_v6 = vld [vmem:[#allocation4 + $0x4] ss:$12 sps:$4 sm:$0xff]   ;;  %v1745_v10 = vld [vmem:[#allocation4 + $0x34] ss:$12 sps:$4 sm:$0xff]   ;;  %v1748_v12 = vld [vmem:[#allocation4 + $0x4c] ss:$12 sps:$4 sm:$0xff]  }
  0x3b   :  { %1033 = vmatprep.subr.bf16.mxu0 %v1739_v6  ;;  %v1740_v9 = vld [vmem:[#allocation4 + $0x18] ss:$12 sps:$4 sm:$0xff]   ;;  %v1743_v11 = vld [vmem:[#allocation4 + $0x30] ss:$12 sps:$4 sm:$0xff]   ;;  %v1746_v13 = vld [vmem:[#allocation4 + $0x48] ss:$12 sps:$4 sm:$0xff]  }
  0x3c   :  { %v1751_v14 = vld [vmem:[#allocation4 + $0x64] ss:$12 sps:$4 sm:$0xff]   ;;  %v1749_v15 = vld [vmem:[#allocation4 + $0x60] ss:$12 sps:$4 sm:$0xff]   ;;  %v1754_v16 = vld [vmem:[#allocation4 + $0x7c] ss:$12 sps:$4 sm:$0xff]  }
  0x3d   :  { %1492 = vmatmul.mubr.msk.bf16.vlgmr.msra.gmra.mrb[0].mxu0 %vm115_vm0, %v68_v5  ;;  %1493 = vmatmul.mubr.msk.bf16.vlgmr.msra.gmra.mrb[0].mxu1 %vm115_vm0, %v68_v5  ;;  %v1752_v17 = vld [vmem:[#allocation4 + $0x78] ss:$12 sps:$4 sm:$0xff]   ;;  %v1757_v18 = vld [vmem:[#allocation4 + $0x94] ss:$12 sps:$4 sm:$0xff]   ;;  %v1755_v19 = vld [vmem:[#allocation4 + $0x90] ss:$12 sps:$4 sm:$0xff]  }
  0x3e   :  { %1034 = vmatpush1.bf16.msra.mxu0 %v1737_v7  ;;  %v1760_v20 = vld [vmem:[#allocation4 + $0xac] ss:$12 sps:$4 sm:$0xff]   ;;  %v1758_v21 = vld [vmem:[#allocation4 + $0xa8] ss:$12 sps:$4 sm:$0xff]   ;;  %v1763_v22 = vld [vmem:[#allocation4 + $0xc4] ss:$12 sps:$4 sm:$0xff]  }
  0x3f   :  { %1035 = vmatprep.subr.bf16.mxu0 %v1742_v8  ;;  %v1764_v23 = vld [vmem:[#allocation4 + $0xc8] ss:$12 sps:$4 sm:$0xff]   ;;  %v1761_v24 = vld [vmem:[#allocation4 + $0xc0] ss:$12 sps:$4 sm:$0xff]   ;;  %v1766_v26 = vld [vmem:[#allocation4 + $0xd8] ss:$12 sps:$4 sm:$0xff]  }
  0x40   :  { %v1765_v25 = vld [vmem:[#allocation4 + $0x8] ss:$12 sps:$4 sm:$0xff]   ;;  %1617 = vmatprep.subr.bf16.mxu1 %v1764_v23  ;;  %v1769_v28 = vld [vmem:[#allocation4 + $0xe0] ss:$12 sps:$4 sm:$0xff]   ;;  %v1774_v31 = vld [vmem:[#allocation4 + $0xf8] ss:$12 sps:$4 sm:$0xff]  }
  0x41   :  { %1618 = vmatpush3.bf16.msra.mxu1 %v1765_v25  ;;  %v1768_v27 = vld [vmem:[#allocation4 + $0xdc] ss:$12 sps:$4 sm:$0xff]   ;;  %v1770_v29 = vld [vmem:[#allocation4 + $0x20] ss:$12 sps:$4 sm:$0xff]   ;;  %v1775_v33 = vld [vmem:[#allocation4 + $0x38] ss:$12 sps:$4 sm:$0xff]  }
  0x42   :  { %1036 = vmatpush1.bf16.msra.mxu0 %v1740_v9  ;;  %v1773_v30 = vld [vmem:[#allocation4 + $0xf4] ss:$12 sps:$4 sm:$0xff]   ;;  %1619 = vmatprep.subr.bf16.mxu1 %v1769_v28  ;;  %v1771_v32 = vld [vmem:[#allocation4 + $0xf0] ss:$12 sps:$4 sm:$0xff]   ;;  %v1778_v34 = vld [vmem:[#allocation4 + $0x10c] ss:$12 sps:$4 sm:$0xff]  }
  0x43   :  { %1037 = vmatprep.subr.bf16.mxu0 %v1745_v10  ;;  %v1779_v35 = vld [vmem:[#allocation4 + $0x110] ss:$12 sps:$4 sm:$0xff]   ;;  %v1776_v36 = vld [vmem:[#allocation4 + $0x108] ss:$12 sps:$4 sm:$0xff]   ;;  %v1781_v40 = vld [vmem:[#allocation4 + $0x120] ss:$12 sps:$4 sm:$0xff]  }
  0x44   :  { %v1780_v37 = vld [vmem:[#allocation4 + $0x50] ss:$12 sps:$4 sm:$0xff]   ;;  %v1784_v39 = vld [vmem:[#allocation4 + $0x128] ss:$12 sps:$4 sm:$0xff]   ;;  %v1789_v43 = vld [vmem:[#allocation4 + $0x140] ss:$12 sps:$4 sm:$0xff]  }
  0x45   :  { %1620 = vmatpush3.bf16.msra.mxu1 %v1770_v29  ;;  %v1783_v38 = vld [vmem:[#allocation4 + $0x124] ss:$12 sps:$4 sm:$0xff]   ;;  %v1785_v41 = vld [vmem:[#allocation4 + $0x68] ss:$12 sps:$4 sm:$0xff]   ;;  %v1790_v45 = vld [vmem:[#allocation4 + $0x80] ss:$12 sps:$4 sm:$0xff]  }
  0x46   :  { %1038 = vmatpush1.bf16.msra.mxu0 %v1743_v11  ;;  %1621 = vmatprep.subr.bf16.mxu1 %v1774_v31  ;;  %v1788_v42 = vld [vmem:[#allocation4 + $0x13c] ss:$12 sps:$4 sm:$0xff]   ;;  %v1786_v44 = vld [vmem:[#allocation4 + $0x138] ss:$12 sps:$4 sm:$0xff]   ;;  %v1793_v46 = vld [vmem:[#allocation4 + $0x154] ss:$12 sps:$4 sm:$0xff]  }
  0x47   :  { %1039 = vmatprep.subr.bf16.mxu0 %v1748_v12  ;;  %v1794_v47 = vld [vmem:[#allocation4 + $0x158] ss:$12 sps:$4 sm:$0xff]   ;;  %v1791_v48 = vld [vmem:[#allocation4 + $0x150] ss:$12 sps:$4 sm:$0xff]   ;;  %v1796_v52 = vld [vmem:[#allocation4 + $0x168] ss:$12 sps:$4 sm:$0xff]  }
  0x48   :  { %v1795_v49 = vld [vmem:[#allocation4 + $0x98] ss:$12 sps:$4 sm:$0xff]   ;;  %v1799_v51 = vld [vmem:[#allocation4 + $0x170] ss:$12 sps:$4 sm:$0xff]   ;;  %v1804_v55 = vld [vmem:[#allocation4 + $0x248] ss:$12 sps:$4 sm:$0xff]  }
  0x49   :  { %1622 = vmatpush3.bf16.msra.mxu1 %v1775_v33  ;;  %v1798_v50 = vld [vmem:[#allocation4 + $0x16c] ss:$12 sps:$4 sm:$0xff]   ;;  %v1800_v53 = vld [vmem:[#allocation4 + $0xb0] ss:$12 sps:$4 sm:$0xff]   ;;  %v2061_v57 = vshrl.u32 %v75_v56, 7  ;;  %vm1981_vm1 = vmmov 0  }
  0x4a   :  { %1040 = vmatpush1.bf16.msra.mxu0 %v1746_v13  ;;  %1623 = vmatprep.subr.bf16.mxu1 %v1779_v35  ;;  %v1803_v54 = vld [vmem:[#allocation4 + $0x184] ss:$12 sps:$4 sm:$0xff]  }
  0x4b   :  { %1041 = vmatprep.subr.bf16.mxu0 %v1751_v14  ;;  %v2064_v58 = vsub.s32 0, %v2061_v57  ;;  %v2067_v59 = vsub.s32 2, %v2061_v57  ;;  %v73_v60 = vld [vmem:[%s2140_s2] ss:$4 sm:$0xf]  ;;  %v2073_v61 = vsub.s32 1, %v2061_v57 }
  0x4c   :  { %v2076_v62 = vsub.s32 3, %v2061_v57 }
  0x4d   :  { %1624 = vmatpush3.bf16.msra.mxu1 %v1780_v37  ;;  %v78_v63 = vrot.slane %v73_v60, %v2064_v58  ;;  %v86_v0 = vrot.slane %v73_v60, %v2067_v59  ;;  %v82_v1 = vrot.slane %v73_v60, %v2073_v61 }
  0x4e   :  { %1042 = vmatpush1.bf16.msra.mxu0 %v1749_v15  ;;  %1625 = vmatprep.subr.bf16.mxu1 %v1784_v39  ;;  %v90_v2 = vrot.slane %v73_v60, %v2076_v62 }
  0x4f   :  { %1043 = vmatprep.subr.bf16.mxu0 %v1754_v16 }
  0x51   :  { %1626 = vmatpush3.bf16.msra.mxu1 %v1785_v41 }
  0x52   :  { %1044 = vmatpush1.bf16.msra.mxu0 %v1752_v17  ;;  %1627 = vmatprep.subr.bf16.mxu1 %v1789_v43 }
  0x53   :  { %1045 = vmatprep.subr.bf16.mxu0 %v1757_v18 }
  0x55   :  { %1628 = vmatpush3.bf16.msra.mxu1 %v1790_v45 }
  0x56   :  { %1046 = vmatpush1.bf16.msra.mxu0 %v1755_v19  ;;  %1629 = vmatprep.subr.bf16.mxu1 %v1794_v47 }
  0x57   :  { %1047 = vmatprep.subr.bf16.mxu0 %v1760_v20 }
  0x59   :  { %1630 = vmatpush3.bf16.msra.mxu1 %v1795_v49 }
  0x5a   :  { %1048 = vmatpush1.bf16.msra.mxu0 %v1758_v21  ;;  %1631 = vmatprep.subr.bf16.mxu1 %v1799_v51 }
  0x5b   :  { %1049 = vmatprep.subr.bf16.mxu0 %v1763_v22 }
  0x5d   :  { %1632 = vmatpush3.bf16.msra.mxu1 %v1800_v53 }
  0x5e   :  { %1050 = vmatpush1.bf16.msra.mxu0 %v1761_v24  ;;  %1639 = vmatprep.subr.bf16.mxu1 %v1804_v55 }
  0x5f   :  { %1051 = vmatprep.subr.bf16.mxu0 %v1768_v27 }
  0x62   :  { %1052 = vmatpush1.bf16.msra.mxu0 %v1766_v26 }
  0x63   :  { %1053 = vmatprep.subr.bf16.mxu0 %v1773_v30 }
  0x66   :  { %1054 = vmatpush1.bf16.msra.mxu0 %v1771_v32 }
  0x67   :  { %1055 = vmatprep.subr.bf16.mxu0 %v1778_v34 }
  0x6a   :  { %1056 = vmatpush1.bf16.msra.mxu0 %v1776_v36 }
  0x6b   :  { %1057 = vmatprep.subr.bf16.mxu0 %v1783_v38 }
  0x6e   :  { %1058 = vmatpush1.bf16.msra.mxu0 %v1781_v40 }
  0x6f   :  { %1059 = vmatprep.subr.bf16.mxu0 %v1788_v42 }
  0x72   :  { %1060 = vmatpush1.bf16.msra.mxu0 %v1786_v44 }
  0x73   :  { %1061 = vmatprep.subr.bf16.mxu0 %v1793_v46 }
  0x76   :  { %1062 = vmatpush1.bf16.msra.mxu0 %v1791_v48 }
  0x77   :  { %1063 = vmatprep.subr.bf16.mxu0 %v1798_v50 }
  0x7a   :  { %1064 = vmatpush1.bf16.msra.mxu0 %v1796_v52 }
  0x7b   :  { %1074 = vmatprep.subr.bf16.mxu0 %v1803_v54 }
 0x110   :  { %v153_v3 = vpop.f32.mrb[0].mxu0  ;;  %v194_v4 = vpop.f32.mrb[0].mxu1 }
 0x111   :  { %v154_v5 = vadd.f32 %v153_v3, %v78_v63  ;;  %v195_v6 = vadd.f32 %v194_v4, %v86_v0  ;;  %v155_v7 = vpop.f32.mrb[1].mxu0  ;;  %v196_v8 = vpop.f32.mrb[1].mxu1 }
 0x112   :  { %v156_v9 = vadd.f32 %v155_v7, %v82_v1  ;;  %v197_v10 = vadd.f32 %v196_v8, %v90_v2  ;;  %v157_v11 = vpop.f32.mrb[2].mxu0  ;;  %v198_v12 = vpop.f32.mrb[2].mxu1 }
 0x113   :  { %v208_v13 = vrot.slane %v154_v5, 4  ;;  %v220_v14 = vrot.slane %v195_v6, 4  ;;  %v158_v15 = vpop.f32.mrb[3].mxu0  ;;  %v199_v16 = vpop.f32.mrb[3].mxu1 }
 0x114   :  { %v214_v17 = vrot.slane %v156_v9, 4  ;;  %v226_v18 = vrot.slane %v197_v10, 4 }
 0x115   :  { %v209_v19 = vadd.f32 %v208_v13, %v154_v5  ;;  %v221_v20 = vadd.f32 %v220_v14, %v195_v6 }
 0x116   :  { %v215_v21 = vadd.f32 %v214_v17, %v156_v9  ;;  %v227_v22 = vadd.f32 %v226_v18, %v197_v10 }
 0x117   :  { %v210_v23 = vrot.slane %v209_v19, 2  ;;  %v222_v24 = vrot.slane %v221_v20, 2 }
 0x118   :  { %v216_v25 = vrot.slane %v215_v21, 2  ;;  %v228_v26 = vrot.slane %v227_v22, 2 }
 0x119   :  { %v211_v27 = vadd.f32 %v210_v23, %v209_v19  ;;  %v223_v28 = vadd.f32 %v222_v24, %v221_v20  ;;  %v1979_v24 = vmov 1966171168  }
 0x11a   :  { %v217_v29 = vadd.f32 %v216_v25, %v215_v21  ;;  %v229_v30 = vadd.f32 %v228_v26, %v227_v22  ;;  %v293_v25 = vunpack.c.l.s4 %v1979_v24 }
 0x11b   :  { %v212_v31 = vrot.slane %v211_v27, 1  ;;  %v224_v32 = vrot.slane %v223_v28, 1 }
 0x11c   :  { %v218_v33 = vrot.slane %v217_v29, 1  ;;  %v230_v34 = vrot.slane %v229_v30, 1  ;;  %v294_v26 = vunpack.c.0.s8 %v293_v25  ;;  %v1831_v25 = vld [vmem:[#allocation4 + $0x210] ss:$12 sps:$4 sm:$0xff]  }
 0x11d   :  { %v213_v35 = vadd.f32 %v212_v31, %v211_v27  ;;  %v225_v36 = vadd.f32 %v224_v32, %v223_v28 }
 0x11e   :  { %v219_v37 = vadd.f32 %v218_v33, %v217_v29  ;;  %v231_v38 = vadd.f32 %v230_v34, %v229_v30  ;;  %v297_v29 = vsub.s32 %v294_v26, %v2061_v57  ;;  %v1835_v26 = vld [vmem:[#allocation4 + $0x218] ss:$12 sps:$4 sm:$0xff]  }
 0x11f   :  { %v232_v39 = vmul.f32 0.125, %v213_v35  ;;  %v234_v40 = vmul.f32 0.125, %v225_v36 }
 0x120   :  { %v233_v41 = vmul.f32 0.125, %v219_v37  ;;  %v235_v42 = vmul.f32 0.125, %v231_v38  ;;  %v1494_v37 = vld [vmem:[%s2140_s2 + $0x1] ss:$4 sm:$0xf] }
 0x121   :  { %v2082_v43 = vsub.f32 %v154_v5, %v232_v39  ;;  %v2084_v44 = vsub.f32 %v195_v6, %v234_v40  ;;  %v2105_v39 = vld [vmem:[%s2140_s2 + $0x2] ss:$4 sm:$0xf] }
 0x122   :  { %v2086_v45 = vsub.f32 %v156_v9, %v233_v41  ;;  %v2088_v46 = vsub.f32 %v197_v10, %v235_v42  ;;  %v351_v57 = vrot.slane %v2105_v39, %v2073_v61  ;;  %v347_v41 = vrot.slane %v2105_v39, %v2064_v58 }
 0x123   :  { %v244_v47 = vmul.f32 %v2082_v43, %v2082_v43  ;;  %v246_v48 = vmul.f32 %v2084_v44, %v2084_v44  ;;  %v359_v42 = vrot.slane %v2105_v39, %v2076_v62  ;;  %v355_v24 = vrot.slane %v2105_v39, %v2067_v59  ;;  %v1847_v39 = vld [vmem:[#allocation4 + $0x270] ss:$12 sps:$4 sm:$0xff]  }
 0x124   :  { %v245_v49 = vmul.f32 %v2086_v45, %v2086_v45  ;;  %v247_v50 = vmul.f32 %v2088_v46, %v2088_v46 }
 0x125   :  { %v248_v51 = vrot.slane %v244_v47, 4  ;;  %v260_v52 = vrot.slane %v246_v48, 4 }
 0x126   :  { %v254_v53 = vrot.slane %v245_v49, 4  ;;  %v266_v54 = vrot.slane %v247_v50, 4 }
 0x127   :  { %v249_v55 = vadd.f32 %v248_v51, %v244_v47  ;;  %v261_v56 = vadd.f32 %v260_v52, %v246_v48 }
 0x128   :  { %v255_v60 = vadd.f32 %v254_v53, %v245_v49  ;;  %v267_v63 = vadd.f32 %v266_v54, %v247_v50 }
 0x129   :  { %v250_v0 = vrot.slane %v249_v55, 2  ;;  %v262_v1 = vrot.slane %v261_v56, 2 }
 0x12a   :  { %v256_v2 = vrot.slane %v255_v60, 2  ;;  %v268_v3 = vrot.slane %v267_v63, 2 }
 0x12b   :  { %v251_v4 = vadd.f32 %v250_v0, %v249_v55  ;;  %v263_v5 = vadd.f32 %v262_v1, %v261_v56 }
 0x12c   :  { %v257_v6 = vadd.f32 %v256_v2, %v255_v60  ;;  %v269_v7 = vadd.f32 %v268_v3, %v267_v63  ;;  %v1801_v3 = vld [vmem:[#allocation4 + $0x180] ss:$12 sps:$4 sm:$0xff]  }
 0x12d   :  { %v252_v8 = vrot.slane %v251_v4, 1  ;;  %v264_v9 = vrot.slane %v263_v5, 1 }
 0x12e   :  { %v258_v10 = vrot.slane %v257_v6, 1  ;;  %v270_v11 = vrot.slane %v269_v7, 1 }
 0x12f   :  { %v253_v12 = vadd.f32 %v252_v8, %v251_v4  ;;  %v265_v13 = vadd.f32 %v264_v9, %v263_v5  ;;  %v1805_v4 = vld [vmem:[#allocation4 + $0x188] ss:$12 sps:$4 sm:$0xff]   ;;  %v1809_v5 = vld [vmem:[#allocation4 + $0x260] ss:$12 sps:$4 sm:$0xff]   ;;  %v1811_v8 = vld [vmem:[#allocation4 + $0x1b0] ss:$12 sps:$4 sm:$0xff]  }
 0x130   :  { %v259_v14 = vadd.f32 %v258_v10, %v257_v6  ;;  %v271_v15 = vadd.f32 %v270_v11, %v269_v7  ;;  %v1813_v6 = vld [vmem:[#allocation4 + $0x1b4] ss:$12 sps:$4 sm:$0xff]   ;;  %v1814_v7 = vld [vmem:[#allocation4 + $0x278] ss:$12 sps:$4 sm:$0xff]   ;;  %v1819_v11 = vld [vmem:[#allocation4 + $0x290] ss:$12 sps:$4 sm:$0xff]  }
 0x131   :  { %v272_v16 = vmul.f32 0.125, %v253_v12  ;;  %v274_v17 = vmul.f32 0.125, %v265_v13  ;;  %v1815_v9 = vld [vmem:[#allocation4 + $0x1b8] ss:$12 sps:$4 sm:$0xff]   ;;  %v1816_v12 = vld [vmem:[#allocation4 + $0x1c8] ss:$12 sps:$4 sm:$0xff]  }
 0x132   :  { %v273_v18 = vmul.f32 0.125, %v259_v14  ;;  %v275_v19 = vmul.f32 0.125, %v271_v15  ;;  %v1818_v10 = vld [vmem:[#allocation4 + $0x1cc] ss:$12 sps:$4 sm:$0xff]   ;;  %v1820_v13 = vld [vmem:[#allocation4 + $0x1d0] ss:$12 sps:$4 sm:$0xff]  }
 0x133   :  { %v278_v20 = vadd.f32 1e-05, %v272_v16  ;;  %v280_v21 = vadd.f32 1e-05, %v274_v17  ;;  %v1823_v14 = vld [vmem:[#allocation4 + $0x1e4] ss:$12 sps:$4 sm:$0xff]  }
 0x134   :  { %v279_v22 = vadd.f32 1e-05, %v273_v18  ;;  %v281_v23 = vadd.f32 1e-05, %v275_v19  ;;  %v1824_v15 = vld [vmem:[#allocation4 + $0x2a8] ss:$12 sps:$4 sm:$0xff]  }
 0x135   :  { %1889 = vrsqrt.f32 %v278_v20  ;;  %v1821_v16 = vld [vmem:[#allocation4 + $0x1e0] ss:$12 sps:$4 sm:$0xff]   ;;  %v1825_v17 = vld [vmem:[#allocation4 + $0x1e8] ss:$12 sps:$4 sm:$0xff]   ;;  %v1826_v20 = vld [vmem:[#allocation4 + $0x1f8] ss:$12 sps:$4 sm:$0xff]  }
 0x136   :  { %1891 = vrsqrt.f32 %v280_v21  ;;  %v1828_v18 = vld [vmem:[#allocation4 + $0x1fc] ss:$12 sps:$4 sm:$0xff]   ;;  %v1829_v19 = vld [vmem:[#allocation4 + $0x2c0] ss:$12 sps:$4 sm:$0xff]  }
 0x137   :  { %1893 = vrsqrt.f32 %v279_v22  ;;  %v1830_v21 = vld [vmem:[#allocation4 + $0x200] ss:$12 sps:$4 sm:$0xff]  }
 0x138   :  { %1895 = vrsqrt.f32 %v281_v23  ;;  %v1833_v22 = vld [vmem:[#allocation4 + $0x214] ss:$12 sps:$4 sm:$0xff]   ;;  %v1834_v23 = vld [vmem:[#allocation4 + $0x2d8] ss:$12 sps:$4 sm:$0xff]  }
 0x13f   :  { %v1890_v27 = vpop.eup %1889 }
 0x140   :  { %v1892_v28 = vpop.eup %1891 }
 0x141   :  { %v1894_v30 = vpop.eup %1893 }
 0x142   :  { %v1896_v31 = vpop.eup %1895  ;;  %v290_v32 = vcombine.low %v1890_v27, %v1894_v30  ;;  %v1838_v27 = vld [vmem:[#allocation4 + $0x22c] ss:$12 sps:$4 sm:$0xff]   ;;  %v1836_v30 = vld [vmem:[#allocation4 + $0x228] ss:$12 sps:$4 sm:$0xff]  }
 0x143   :  { %v291_v33 = vcombine.low %v1892_v28, %v1896_v31  ;;  %v1839_v28 = vld [vmem:[#allocation4 + $0x2f0] ss:$12 sps:$4 sm:$0xff]  }
 0x144   :  { %v298_v34 = vrot.slane %v290_v32, %v297_v29  ;;  %v1840_v31 = vld [vmem:[#allocation4 + $0x230] ss:$12 sps:$4 sm:$0xff]  }
 0x145   :  { %v305_v35 = vrot.slane %v291_v33, %v297_v29  ;;  %v1843_v32 = vld [vmem:[#allocation4 + $0x244] ss:$12 sps:$4 sm:$0xff]  }
 0x147   :  { %v306_v36 = vcombine.low %v298_v34, %v305_v35  ;;  %v1841_v34 = vld [vmem:[#allocation4 + $0x240] ss:$12 sps:$4 sm:$0xff]  }
 0x149   :  { %v313_v38 = vrot.slane %v306_v36, %v297_v29  ;;  %v1846_v36 = vld [vmem:[#allocation4 + $0x25c] ss:$12 sps:$4 sm:$0xff]  }
 0x14b   :  { %v315_v40 = vmul.f32 %v1494_v37, %v313_v38  ;;  %v1844_v37 = vld [vmem:[#allocation4 + $0x258] ss:$12 sps:$4 sm:$0xff]   ;;  %v1849_v38 = vld [vmem:[#allocation4 + $0x274] ss:$12 sps:$4 sm:$0xff]  }
 0x14d   :  { %v324_v47 = vrot.slane %v315_v40, %v2073_v61  ;;  %v320_v48 = vrot.slane %v315_v40, %v2064_v58  ;;  %v332_v49 = vrot.slane %v315_v40, %v2076_v62  ;;  %v328_v50 = vrot.slane %v315_v40, %v2067_v59  ;;  %v1852_v40 = vld [vmem:[#allocation4 + $0x28c] ss:$12 sps:$4 sm:$0xff]  }
 0x14f   :  { %v338_v51 = vmul.f32 %v324_v47, %v2086_v45  ;;  %v337_v52 = vmul.f32 %v320_v48, %v2082_v43  ;;  %v340_v53 = vmul.f32 %v332_v49, %v2088_v46  ;;  %v2121_v54 = vmul.f32 %v328_v50, %v2084_v44  ;;  %v1808_v45 = vld [vmem:[#allocation4 + $0x19c] ss:$12 sps:$4 sm:$0xff]   ;;  %v1806_v44 = vld [vmem:[#allocation4 + $0x198] ss:$12 sps:$4 sm:$0xff]   ;;  %v1810_v46 = vld [vmem:[#allocation4 + $0x1a0] ss:$12 sps:$4 sm:$0xff]  }
 0x150   :  { %v1858_v47 = vld [vmem:[#allocation4 + $0x2bc] ss:$12 sps:$4 sm:$0xff]   ;;  %v1856_v48 = vld [vmem:[#allocation4 + $0x2b8] ss:$12 sps:$4 sm:$0xff]   ;;  %v1861_v49 = vld [vmem:[#allocation4 + $0x2d4] ss:$12 sps:$4 sm:$0xff]  }
 0x151   :  { %v365_v55 = vadd.f32 %v351_v57, %v338_v51  ;;  %v364_v56 = vadd.f32 %v347_v41, %v337_v52  ;;  %v367_v60 = vadd.f32 %v359_v42, %v340_v53  ;;  %v366_v29 = vadd.f32 %v355_v24, %v2121_v54  ;;  %v1850_v57 = vld [vmem:[#allocation4 + $0x288] ss:$12 sps:$4 sm:$0xff]   ;;  %v1855_v41 = vld [vmem:[#allocation4 + $0x2a4] ss:$12 sps:$4 sm:$0xff]   ;;  %v1853_v42 = vld [vmem:[#allocation4 + $0x2a0] ss:$12 sps:$4 sm:$0xff]  }
 0x152   :  { %v1859_v50 = vld [vmem:[#allocation4 + $0x2d0] ss:$12 sps:$4 sm:$0xff]   ;;  %v1864_v51 = vld [vmem:[#allocation4 + $0x2ec] ss:$12 sps:$4 sm:$0xff]   ;;  %v1862_v52 = vld [vmem:[#allocation4 + $0x2e8] ss:$12 sps:$4 sm:$0xff]  }
 0x153   :  { %v369_v63 = vmax.f32 %v365_v55, 0.0  ;;  %v368_v0 = vmax.f32 %v364_v56, 0.0  ;;  %v371_v1 = vmax.f32 %v367_v60, 0.0  ;;  %v370_v33 = vmax.f32 %v366_v29, 0.0  ;;  %v1865_v53 = vld [vmem:[#allocation6 + $0x40] sm:$0xff]   ;;  %v1867_v55 = vld [vmem:[#allocation6 + $0x48] sm:$0xff]  }
 0x154   :  { %v1866_v54 = vld [vmem:[#allocation6] sm:$0xff]   ;;  %v1868_v56 = vld [vmem:[#allocation6 + $0x8] sm:$0xff]   ;;  %v1869_v60 = vld [vmem:[#allocation6 + $0x50] sm:$0xff]  }
 0x155   :  { %v373_v2 = vpack.c.bf16 %v369_v63, %v369_v63  ;;  %v372_v62 = vpack.c.bf16 %v368_v0, %v368_v0  ;;  %v375_v43 = vpack.c.bf16 %v371_v1, %v371_v1  ;;  %v374_v35 = vpack.c.bf16 %v370_v33, %v370_v33  ;;  %v1870_v63 = vld [vmem:[#allocation6 + $0x10] sm:$0xff]   ;;  %v1871_v0 = vld [vmem:[#allocation6 + $0x58] sm:$0xff]   ;;  %v1885_v33 = vld [vmem:[#allocation6 + $0xa0] sm:$0xff]  }
 0x156   :  { %v1872_v1 = vld [vmem:[#allocation6 + $0x18] sm:$0xff]  }
 0x157   :  { %1065 = vmatprep.mubr.bf16.mxu0 %v373_v2  ;;  %1147 = vmatprep.mubr.bf16.mxu1 %v373_v2  ;;  %v1873_v2 = vld [vmem:[#allocation6 + $0x60] sm:$0xff]  }
 0x158   :  { %1066 = vmatmul.mubr.bf16.vlgmr.msra.gmra.mrb[4].mxu0 %v372_v62  ;;  %1148 = vmatmul.mubr.bf16.vlgmr.msra.gmra.mrb[4].mxu1 %v372_v62  ;;  %v1875_v62 = vld [vmem:[#allocation6 + $0x68] sm:$0xff]  }
 0x159   :  { %1075 = vmatpush1.bf16.msra.mxu0 %v1801_v3  ;;  %1640 = vmatpush3.bf16.msra.mxu1 %v1805_v4  ;;  %v1874_v3 = vld [vmem:[#allocation6 + $0x20] sm:$0xff]   ;;  %v1876_v4 = vld [vmem:[#allocation6 + $0x28] sm:$0xff]  }
 0x15a   :  { %1106 = vmatprep.mubr.bf16.mxu0 %v375_v43  ;;  %1187 = vmatprep.mubr.bf16.mxu1 %v375_v43  ;;  %v1879_v43 = vld [vmem:[#allocation6 + $0x78] sm:$0xff]  }
 0x15b   :  { %1076 = vmatprep.subr.bf16.mxu0 %v1808_v45  ;;  %1641 = vmatprep.subr.bf16.mxu1 %v1809_v5  ;;  %v1877_v45 = vld [vmem:[#allocation6 + $0x70] sm:$0xff]  }
 0x15c   :  { %v1878_v5 = vld [vmem:[#allocation6 + $0x30] sm:$0xff]  }
 0x15d   :  { %1077 = vmatpush1.bf16.msra.mxu0 %v1806_v44  ;;  %1642 = vmatpush3.bf16.msra.mxu1 %v1810_v46  ;;  %v1880_v44 = vld [vmem:[#allocation6 + $0x38] sm:$0xff]   ;;  %v1980_v46 = vmov 0.0  }
 0x15e   :  { %1078 = vmatprep.subr.bf16.mxu0 %v1813_v6  ;;  %1643 = vmatprep.subr.bf16.mxu1 %v1814_v7 }
 0x161   :  { %1079 = vmatpush1.bf16.msra.mxu0 %v1811_v8  ;;  %1644 = vmatpush3.bf16.msra.mxu1 %v1815_v9 }
 0x162   :  { %1080 = vmatprep.subr.bf16.mxu0 %v1818_v10  ;;  %1645 = vmatprep.subr.bf16.mxu1 %v1819_v11  ;;  %v504_v11 = vld [vmem:[%s2142_s4] sm:$0x7] }
 0x165   :  { %1081 = vmatpush1.bf16.msra.mxu0 %v1816_v12  ;;  %1646 = vmatpush3.bf16.msra.mxu1 %v1820_v13  ;;  %v517_v12 = vrot.slane %v504_v11, %v2067_v59 }
 0x166   :  { %1082 = vmatprep.subr.bf16.mxu0 %v1823_v14  ;;  %1647 = vmatprep.subr.bf16.mxu1 %v1824_v15 }
 0x169   :  { %1083 = vmatpush1.bf16.msra.mxu0 %v1821_v16  ;;  %1648 = vmatpush3.bf16.msra.mxu1 %v1825_v17 }
 0x16a   :  { %1084 = vmatprep.subr.bf16.mxu0 %v1828_v18  ;;  %1649 = vmatprep.subr.bf16.mxu1 %v1829_v19 }
 0x16d   :  { %1085 = vmatpush1.bf16.msra.mxu0 %v1826_v20  ;;  %1650 = vmatpush3.bf16.msra.mxu1 %v1830_v21  ;;  %v509_v20 = vrot.slane %v504_v11, %v2064_v58  ;;  %v513_v21 = vrot.slane %v504_v11, %v2073_v61  ;;  %v1883_v58 = vld [vmem:[#allocation6 + $0x90] sm:$0xff]   ;;  %v1884_v61 = vld [vmem:[#allocation6 + $0x98] sm:$0xff]  }
 0x16e   :  { %1086 = vmatprep.subr.bf16.mxu0 %v1833_v22  ;;  %1651 = vmatprep.subr.bf16.mxu1 %v1834_v23 }
 0x171   :  { %1087 = vmatpush1.bf16.msra.mxu0 %v1831_v25  ;;  %1652 = vmatpush3.bf16.msra.mxu1 %v1835_v26 }
 0x172   :  { %1088 = vmatprep.subr.bf16.mxu0 %v1838_v27  ;;  %1653 = vmatprep.subr.bf16.mxu1 %v1839_v28 }
 0x175   :  { %1089 = vmatpush1.bf16.msra.mxu0 %v1836_v30  ;;  %1654 = vmatpush3.bf16.msra.mxu1 %v1840_v31  ;;  %v1881_v30 = vld [vmem:[#allocation6 + $0x80] sm:$0xff]  }
 0x176   :  { %1090 = vmatprep.subr.bf16.mxu0 %v1843_v32  ;;  %1661 = vmatprep.subr.bf16.mxu1 %v1865_v53  ;;  %v1882_v32 = vld [vmem:[#allocation6 + $0x88] sm:$0xff]  }
 0x178   :  { %1188 = vmatmul.mubr.bf16.vlgmr.msra.gmra.mrb[8].mxu1 %v374_v35 }
 0x179   :  { %1091 = vmatpush1.bf16.msra.mxu0 %v1841_v34  ;;  %1662 = vmatpush3.bf16.msra.mxu1 %v1866_v54  ;;  %v1886_v34 = vld [vmem:[#allocation6 + $0xa8] sm:$0xff]  }
 0x17a   :  { %1092 = vmatprep.subr.bf16.mxu0 %v1846_v36  ;;  %1663 = vmatprep.subr.bf16.mxu1 %v1867_v55  ;;  %v1888_v36 = vld [vmem:[#allocation6 + $0xb8] sm:$0xff]  }
 0x17d   :  { %1093 = vmatpush1.bf16.msra.mxu0 %v1844_v37  ;;  %1664 = vmatpush3.bf16.msra.mxu1 %v1868_v56 }
 0x17e   :  { %1094 = vmatprep.subr.bf16.mxu0 %v1849_v38  ;;  %1665 = vmatprep.subr.bf16.mxu1 %v1869_v60 }
 0x181   :  { %1095 = vmatpush1.bf16.msra.mxu0 %v1847_v39  ;;  %1666 = vmatpush3.bf16.msra.mxu1 %v1870_v63 }
 0x182   :  { %1096 = vmatprep.subr.bf16.mxu0 %v1852_v40  ;;  %1667 = vmatprep.subr.bf16.mxu1 %v1871_v0 }
 0x185   :  { %1097 = vmatpush1.bf16.msra.mxu0 %v1850_v57  ;;  %1668 = vmatpush3.bf16.msra.mxu1 %v1872_v1 }
 0x186   :  { %1098 = vmatprep.subr.bf16.mxu0 %v1855_v41  ;;  %1669 = vmatprep.subr.bf16.mxu1 %v1873_v2 }
 0x189   :  { %1099 = vmatpush1.bf16.msra.mxu0 %v1853_v42  ;;  %1670 = vmatpush3.bf16.msra.mxu1 %v1874_v3 }
 0x18a   :  { %1100 = vmatprep.subr.bf16.mxu0 %v1858_v47  ;;  %1671 = vmatprep.subr.bf16.mxu1 %v1875_v62  ;;  %v1592_v47 = vld [vmem:[%s2144_s6] ss:$0 sm:$0xff] }
 0x18d   :  { %1101 = vmatpush1.bf16.msra.mxu0 %v1856_v48  ;;  %1672 = vmatpush3.bf16.msra.mxu1 %v1876_v4 }
 0x18e   :  { %1102 = vmatprep.subr.bf16.mxu0 %v1861_v49  ;;  %1673 = vmatprep.subr.bf16.mxu1 %v1877_v45 }
 0x191   :  { %1103 = vmatpush1.bf16.msra.mxu0 %v1859_v50  ;;  %1674 = vmatpush3.bf16.msra.mxu1 %v1878_v5 }
 0x192   :  { %1104 = vmatprep.subr.bf16.mxu0 %v1864_v51  ;;  %1675 = vmatprep.subr.bf16.mxu1 %v1879_v43 }
 0x195   :  { %1105 = vmatpush1.bf16.msra.mxu0 %v1862_v52  ;;  %1676 = vmatpush3.bf16.msra.mxu1 %v1880_v44 }
 0x196   :  { %1692 = vmatprep.subr.bf16.mxu1 %v1980_v46 }
 0x198   :  { %1107 = vmatmul.mubr.bf16.vlgmr.msra.gmra.mrb[4].mxu0 %v374_v35  ;;  %v1887_v35 = vld [vmem:[#allocation6 + $0xb0] sm:$0xff]  }
 0x22b   :  { %v1633_v6 = vpop.f32.mrb[4].mxu1 }
 0x22c   :  { %v1634_v7 = vpop.f32.mrb[5].mxu1 }
 0x22d   :  { %v1635_v8 = vadd.f32 %v1634_v7, %v1633_v6  ;;  %v1636_v9 = vpop.f32.mrb[6].mxu1 }
 0x22e   :  { %v1637_v10 = vpop.f32.mrb[7].mxu1 }
 0x22f   :  { %v1150_v15 = vadd.f32 %v1635_v8, %v517_v12 }
 0x24b   :  { %v1655_v13 = vpop.f32.mrb[8].mxu1 }
 0x24c   :  { %v1656_v14 = vpop.f32.mrb[9].mxu1 }
 0x24d   :  { %v1657_v16 = vadd.f32 %v1656_v14, %v1655_v13  ;;  %v1658_v17 = vpop.f32.mrb[10].mxu1 }
 0x24e   :  { %v1659_v18 = vpop.f32.mrb[11].mxu1 }
 0x24f   :  { %v1190_v19 = vadd.f32 %v1657_v16, %v1150_v15 }
 0x251   :  { %v1197_v37 = vmax.f32 %v1190_v19, 0.0 }
 0x253   :  { %v1200_v38 = vpack.c.bf16 %v1197_v37, %v1197_v37 }
 0x26b   :  { %v1108_v22 = vpop.f32.mrb[4].mxu0 }
 0x26c   :  { %v1712_v23 = vadd.f32 %v1108_v22, %v509_v20  ;;  %v1110_v24 = vpop.f32.mrb[5].mxu0 }
 0x26d   :  { %v1713_v25 = vadd.f32 %v1110_v24, %v513_v21  ;;  %v1112_v26 = vpop.f32.mrb[6].mxu0 }
 0x26e   :  { %v1195_v27 = vmax.f32 %v1712_v23, 0.0  ;;  %v1113_v28 = vpop.f32.mrb[7].mxu0 }
 0x26f   :  { %v1196_v29 = vmax.f32 %v1713_v25, 0.0 }
 0x270   :  { %v1198_v31 = vpack.c.bf16 %v1195_v27, %v1195_v27 }
 0x271   :  { %v1199_v59 = vpack.c.bf16 %v1196_v29, %v1196_v29 }
 0x273   :  { %1432 = vmatprep.mubr.bf16.mxu1 %v1199_v59 }
 0x274   :  { %1433 = vmatmul.mubr.bf16.vlgmr.msra.gmra.mrb[12].mxu1 %v1198_v31 }
 0x275   :  { %1693 = vmatpush3.bf16.msra.mxu1 %v1881_v30  ;;  %1708 = vmatprep.mubr.msk.bf16.mxu1 %vm1981_vm1, %v1980_v46 }
 0x276   :  { %1694 = vmatprep.subr.bf16.mxu1 %v1980_v46 }
 0x279   :  { %1695 = vmatpush3.bf16.msra.mxu1 %v1882_v32 }
 0x27a   :  { %1696 = vmatprep.subr.bf16.mxu1 %v1980_v46 }
 0x27d   :  { %1697 = vmatpush3.bf16.msra.mxu1 %v1883_v58 }
 0x27e   :  { %1698 = vmatprep.subr.bf16.mxu1 %v1980_v46 }
 0x281   :  { %1699 = vmatpush3.bf16.msra.mxu1 %v1884_v61 }
 0x282   :  { %1700 = vmatprep.subr.bf16.mxu1 %v1980_v46 }
 0x285   :  { %1701 = vmatpush3.bf16.msra.mxu1 %v1885_v33 }
 0x286   :  { %1702 = vmatprep.subr.bf16.mxu1 %v1980_v46 }
 0x289   :  { %1703 = vmatpush3.bf16.msra.mxu1 %v1886_v34 }
 0x28a   :  { %1704 = vmatprep.subr.bf16.mxu1 %v1980_v46 }
 0x28d   :  { %1705 = vmatpush3.bf16.msra.mxu1 %v1887_v35 }
 0x28e   :  { %1706 = vmatprep.subr.bf16.mxu1 %v1980_v46 }
 0x291   :  { %1707 = vmatpush3.bf16.msra.mxu1 %v1888_v36 }
 0x294   :  { %1709 = vmatmul.mubr.bf16.vlgmr.msra.gmra.mrb[16].mxu1 %v1200_v38 }
 0x347   :  { %v1677_v39 = vpop.f32.mrb[12].mxu1 }
 0x348   :  { %v1678_v40 = vpop.f32.mrb[13].mxu1 }
 0x349   :  { %v1679_v57 = vadd.f32 %v1678_v40, %v1677_v39  ;;  %v1680_v41 = vpop.f32.mrb[14].mxu1 }
 0x34a   :  { %v1681_v42 = vpop.f32.mrb[15].mxu1 }
 0x34b   :  { %v1435_v48 = vadd.f32 %v1679_v57, %v1592_v47 }
 0x367   :  { %v1474_v49 = vpop.f32.mrb[16].mxu1 }
 0x368   :  { %v1475_v50 = vadd.f32 %v1474_v49, %v1435_v48  ;;  %v1710_v51 = vpop.f32.mrb[17].mxu1 }
 0x369   :  { %v1477_v52 = vpop.f32.mrb[18].mxu1 }
 0x36a   :  { %1897 = vtanh.f32 %v1475_v50  ;;  %v1711_v53 = vpop.f32.mrb[19].mxu1 }
 0x374   :  { %v1898_v54 = vpop.eup %1897 }
 0x375   :  { %1481 = vst [vmem:[%s2145_s7] sm:$0xff] %v1898_v54 }
 0x376   :  { %1486 = vsyncpa [#allocation3], 1 }
 0x377   :  { %1487 = vsyncpa [#allocation5], 1 }

</bundles_post_ra>
